<compile_context>
chip_gen: v7x
topology: tpu7x:2x2x1
jax: 0.10.0
libtpu: 0.0.40
codegen_flags: <defaults>
</compile_context>

<pallas_src>
import functools

import jax
import jax.numpy as jnp
from jax import lax
from jax.experimental import pallas as pl
from jax.experimental.pallas import tpu as pltpu


def _cln_kernel(x_ref, gain_ref, bias_ref, o_ref, carry_ref, *,
                eps, n_chan, bb, t_total, t_block):
    """One (batch-group, time-block) grid step of cumulative LayerNorm.

    x_ref:     (Bb, C, Tb)  current time tile of Bb packed batch elements
    gain_ref:  (1, C, 1)    resident across the whole grid (constant index_map)
    bias_ref:  (1, C, 1)
    o_ref:     (Bb, C, Tb)
    carry_ref: (2*Bb, 1) f32  running [cum_sum; cum_pow_sum] across T tiles
    """
    t_blk = pl.program_id(1)

    # Reset the running prefix at the start of every batch group.
    @pl.when(t_blk == 0)
    def _():
        carry_ref[...] = jnp.zeros_like(carry_ref)

    x = x_ref[...].astype(jnp.float32)            # (Bb, C, Tb)
    tb = x.shape[-1]

    # Per-time-step channel reductions (cross-sublane reduce).
    step_sum = jnp.sum(x, axis=1)                 # (Bb, Tb)
    step_pow = jnp.sum(x * x, axis=1)             # (Bb, Tb)

    lane = lax.broadcasted_iota(jnp.int32, (1, tb), 1)      # (1, Tb)
    t_glob = lane + t_blk * t_block                          # global time index

    # Ragged final block: zero the >= T lanes so garbage never enters the scan.
    # (Static condition; no code is emitted when T divides evenly into tiles.)
    if t_total % t_block != 0:
        valid = t_glob < t_total
        step_sum = jnp.where(valid, step_sum, 0.0)
        step_pow = jnp.where(valid, step_pow, 0.0)

    # Stack both running statistics so a single scan handles them together.
    s = jnp.concatenate([step_sum, step_pow], axis=0)        # (2*Bb, Tb)

    # Inclusive prefix sum along lanes: Hillis-Steele scan with log2(Tb)
    # roll (XLU) + masked add (VPU) steps -- no O(T^2) matrix, no MXU.
    shift = 1
    while shift < tb:
        rolled = pltpu.roll(s, shift=shift, axis=1)          # rolled[t] = s[t-shift]
        s = s + jnp.where(lane >= shift, rolled, 0.0)
        shift *= 2

    # Add the prefix carried in from previous time tiles, save the new prefix.
    s = s + carry_ref[...]                                   # (2*Bb,1) broadcasts over lanes
    carry_ref[...] = s[:, tb - 1:tb]

    cum_sum = s[:bb, :]                                      # (Bb, Tb)
    cum_pow = s[bb:, :]                                      # (Bb, Tb)

    # entry_cnt[t] = C * (global_t + 1); one reciprocal shared by mean and var.
    inv_cnt = 1.0 / ((t_glob.astype(jnp.float32) + 1.0) * jnp.float32(n_chan))

    cum_mean = cum_sum * inv_cnt
    # Algebraically equal to (pow - 2*mean*sum)/cnt + mean^2; the clamp guards
    # against a tiny negative rounding result before the rsqrt.
    cum_var = jnp.maximum(cum_pow * inv_cnt - cum_mean * cum_mean, 0.0)
    # rsqrt runs on the otherwise-idle EUP slot; the (Bb, C, Tb) tile below
    # only sees broadcast multiplies.
    inv_std = lax.rsqrt(cum_var + jnp.float32(eps))          # (Bb, Tb)

    gain = gain_ref[...].astype(jnp.float32)                 # (1, C, 1)
    bias = bias_ref[...].astype(jnp.float32)                 # (1, C, 1)

    xn = (x - cum_mean[:, None, :]) * inv_std[:, None, :]
    o_ref[...] = (xn * gain + bias).astype(o_ref.dtype)


def _round_up(n, m):
    return (n + m - 1) // m * m


def cln_pallas(x, gain, bias, eps=1e-8):
    """Cumulative LayerNorm.  x: (B, C, T), gain/bias: (1, C, 1)."""
    B, C, T = x.shape
    itemsize = jnp.dtype(x.dtype).itemsize

    # --- batch folding: when C under-fills the 8 f32 sublanes, pack several
    # batch elements per block to raise bytes moved per grid step.
    bb = 1
    if C < 8 and B > 1:
        want = min(B, max(1, 8 // max(C, 1)))
        for cand in range(want, 0, -1):
            if B % cand == 0:
                bb = cand
                break

    # --- adaptive lane-dense time tile: target ~2 MiB of input per grid step,
    # multiple of 128, clamped to [512, 8192] and to a v7x-safe VMEM budget.
    target_bytes = 2 << 20
    row_bytes = max(1, bb * C * itemsize)
    tb = _round_up(max(1, target_bytes // row_bytes), 128)
    tb = max(512, min(tb, 8192))
    # v7x budget: ~5 f32-equivalent copies of the block must stay well under 64 MiB.
    vmem_cap = 40 << 20
    max_tb_vmem = max(128, (vmem_cap // (5 * 4 * max(1, bb * C))) // 128 * 128)
    tb = min(tb, max_tb_vmem)
    if tb >= T:
        # Single time block; last dim equals the full array dim -> (8,128) rule ok,
        # and no ragged-tail masking is needed.
        tb = T
    n_t = pl.cdiv(T, tb)

    # Scoped-VMEM estimate: 2x double-buffered inputs + 2x outputs + f32 temps.
    blk_io = bb * C * tb * itemsize
    blk_f32 = bb * C * tb * 4
    est = 4 * blk_io + 3 * blk_f32 + (1 << 20)
    vmem_limit = int(min(max(est, 32 << 20), 48 << 20))

    kernel = functools.partial(_cln_kernel, eps=eps, n_chan=C, bb=bb,
                               t_total=T, t_block=tb)
    out = pl.pallas_call(
        kernel,
        out_shape=jax.ShapeDtypeStruct((B, C, T), x.dtype),
        grid_spec=pltpu.PrefetchScalarGridSpec(
            num_scalar_prefetch=0,
            grid=(B // bb, n_t),
            in_specs=[
                pl.BlockSpec((bb, C, tb), lambda b, t: (b, 0, t)),
                pl.BlockSpec((1, C, 1), lambda b, t: (0, 0, 0)),   # gain: resident
                pl.BlockSpec((1, C, 1), lambda b, t: (0, 0, 0)),   # bias: resident
            ],
            out_specs=pl.BlockSpec((bb, C, tb), lambda b, t: (b, 0, t)),
            scratch_shapes=[pltpu.VMEM((2 * bb, 1), jnp.float32)],  # prefix carry
        ),
        compiler_params=pltpu.CompilerParams(
            # Batch groups are independent (megacore-parallel on v7x); the time
            # axis carries the cumulative prefix, so it must stay sequential.
            dimension_semantics=("parallel", "arbitrary"),
            vmem_limit_bytes=vmem_limit,
        ),
    )(x, gain, bias)
    return out


def cln_reference(x, gain, bias, eps=1e-8):
    """Pure-JAX reference mirroring the PyTorch forward."""
    B, C, T = x.shape
    step_sum = jnp.sum(x, axis=1)                     # (B, T)
    step_pow_sum = jnp.sum(x * x, axis=1)             # (B, T)
    cum_sum = jnp.cumsum(step_sum, axis=1)            # (B, T)
    cum_pow_sum = jnp.cumsum(step_pow_sum, axis=1)    # (B, T)
    entry_cnt = jnp.arange(C, C * (T + 1), C, dtype=x.dtype).reshape(1, T)
    cum_mean = cum_sum / entry_cnt
    cum_var = (cum_pow_sum - 2 * cum_mean * cum_sum) / entry_cnt + cum_mean ** 2
    cum_std = jnp.sqrt(cum_var + eps)
    xn = (x - cum_mean[:, None, :]) / cum_std[:, None, :]
    return xn * gain + bias


if __name__ == "__main__":
    B, C, T = 2, 4, 16          # small shapes consistent with (batch, dimension, time)
    key = jax.random.PRNGKey(0)
    x = jax.random.normal(key, (B, C, T), dtype=jnp.float32)

    # Deterministic parameter init, matching nn.Parameter(torch.ones/zeros(1, dimension, 1))
    gain = jnp.ones((1, C, 1), dtype=jnp.float32)
    bias = jnp.zeros((1, C, 1), dtype=jnp.float32)

    out = cln_pallas(x, gain, bias)
    out = jax.block_until_ready(out)

    ref = cln_reference(x, gain, bias)
    assert out.shape == (B, C, T)
    assert jnp.allclose(out, ref, atol=1e-5, rtol=1e-5), "mismatch vs reference"
    print("KERNEL_OK")
</pallas_src>

<mosaic_0001>
module attributes {stable_mosaic.version = 11 : i64} {
  func.func @_cln_kernel(%arg0: i32, %arg1: i32, %arg2: memref<2x4x16xf32, #tpu.memory_space<vmem>>, %arg3: memref<1x4x1xf32, #tpu.memory_space<vmem>>, %arg4: memref<1x4x1xf32, #tpu.memory_space<vmem>>, %arg5: memref<2x4x16xf32, #tpu.memory_space<vmem>>, %arg6: memref<4x1xf32, #tpu.memory_space<vmem>>) attributes {dimension_semantics = [#tpu.dimension_semantics<parallel>, #tpu.dimension_semantics<arbitrary>], iteration_bounds = array<i64: 1, 1>, scalar_prefetch = 0 : i64, scratch_operands = 1 : i64, tpu.core_type = #tpu.core_type<tc>, window_params = [{transform_indices = @transform_0, window_bounds = array<i64: 2, 4, 16>}, {pipeline_mode = #tpu.pipeline_mode<synchronous>, transform_indices = @transform_1, window_bounds = array<i64: 1, 4, 1>}, {pipeline_mode = #tpu.pipeline_mode<synchronous>, transform_indices = @transform_2, window_bounds = array<i64: 1, 4, 1>}, {transform_indices = @transform_3, window_bounds = array<i64: 2, 4, 16>}]} {
    %c0_i32 = arith.constant 0 : i32
    %0 = arith.cmpi eq, %arg1, %c0_i32 : i32
    %1 = arith.extui %0 : i1 to i32
    %c0_i32_0 = arith.constant 0 : i32
    %2 = arith.cmpi ne, %1, %c0_i32_0 : i32
    scf.if %2 {
      %cst_30 = arith.constant 0.000000e+00 : f32
      %82 = vector.broadcast %cst_30 : f32 to vector<4x1xf32>
      %c0_31 = arith.constant 0 : index
      %c0_32 = arith.constant 0 : index
      %83 = vector.load %arg6[%c0_31, %c0_32] : memref<4x1xf32, #tpu.memory_space<vmem>>, vector<4x1xf32>
      tpu.vector_store %arg6[%c0_31, %c0_32], %82 {strides = array<i32>} : memref<4x1xf32, #tpu.memory_space<vmem>>, vector<4x1xf32>,
    } else {
    }
    %c0 = arith.constant 0 : index
    %c0_1 = arith.constant 0 : index
    %c0_2 = arith.constant 0 : index
    %3 = vector.load %arg2[%c0, %c0_1, %c0_2] : memref<2x4x16xf32, #tpu.memory_space<vmem>>, vector<2x4x16xf32>
    %cst = arith.constant dense<0.000000e+00> : vector<2x16xf32>
    %4 = vector.multi_reduction <add>, %3, %cst [1] : vector<2x4x16xf32> to vector<2x16xf32>
    %5 = arith.mulf %3, %3 : vector<2x4x16xf32>
    %cst_3 = arith.constant dense<0.000000e+00> : vector<2x16xf32>
    %6 = vector.multi_reduction <add>, %5, %cst_3 [1] : vector<2x4x16xf32> to vector<2x16xf32>
    %7 = tpu.iota {dimensions = array<i32: 1>} : vector<1x16xi32>
    %c16_i32 = arith.constant 16 : i32
    %8 = arith.muli %arg1, %c16_i32 : i32
    %9 = vector.broadcast %8 : i32 to vector<1x16xi32>
    %10 = arith.addi %7, %9 : vector<1x16xi32>
    %11 = tpu.concatenate %4, %6 in 0 : vector<2x16xf32>, vector<2x16xf32> -> vector<4x16xf32>
    %c1_i32 = arith.constant 1 : i32
    %12 = tpu.dynamic_rotate %11 by %c1_i32 dim 1 : vector<4x16xf32>, i32 -> vector<4x16xf32>
    %c1_i32_4 = arith.constant 1 : i32
    %13 = vector.broadcast %c1_i32_4 : i32 to vector<1x16xi32>
    %14 = arith.cmpi sge, %7, %13 : vector<1x16xi32>
    %cst_5 = arith.constant 0.000000e+00 : f32
    %15 = vector.shape_cast %14 : vector<1x16xi1> to vector<1x16xi1>
    %16 = vector.broadcast %15 : vector<1x16xi1> to vector<4x16xi1>
    %17 = vector.broadcast %cst_5 : f32 to vector<4x16xf32>
    %18 = arith.select %16, %12, %17 : vector<4x16xi1>, vector<4x16xf32>
    %19 = arith.addf %11, %18 : vector<4x16xf32>
    %c2_i32 = arith.constant 2 : i32
    %20 = tpu.dynamic_rotate %19 by %c2_i32 dim 1 : vector<4x16xf32>, i32 -> vector<4x16xf32>
    %c2_i32_6 = arith.constant 2 : i32
    %21 = vector.broadcast %c2_i32_6 : i32 to vector<1x16xi32>
    %22 = arith.cmpi sge, %7, %21 : vector<1x16xi32>
    %cst_7 = arith.constant 0.000000e+00 : f32
    %23 = vector.shape_cast %22 : vector<1x16xi1> to vector<1x16xi1>
    %24 = vector.broadcast %23 : vector<1x16xi1> to vector<4x16xi1>
    %25 = vector.broadcast %cst_7 : f32 to vector<4x16xf32>
    %26 = arith.select %24, %20, %25 : vector<4x16xi1>, vector<4x16xf32>
    %27 = arith.addf %19, %26 : vector<4x16xf32>
    %c4_i32 = arith.constant 4 : i32
    %28 = tpu.dynamic_rotate %27 by %c4_i32 dim 1 : vector<4x16xf32>, i32 -> vector<4x16xf32>
    %c4_i32_8 = arith.constant 4 : i32
    %29 = vector.broadcast %c4_i32_8 : i32 to vector<1x16xi32>
    %30 = arith.cmpi sge, %7, %29 : vector<1x16xi32>
    %cst_9 = arith.constant 0.000000e+00 : f32
    %31 = vector.shape_cast %30 : vector<1x16xi1> to vector<1x16xi1>
    %32 = vector.broadcast %31 : vector<1x16xi1> to vector<4x16xi1>
    %33 = vector.broadcast %cst_9 : f32 to vector<4x16xf32>
    %34 = arith.select %32, %28, %33 : vector<4x16xi1>, vector<4x16xf32>
    %35 = arith.addf %27, %34 : vector<4x16xf32>
    %c8_i32 = arith.constant 8 : i32
    %36 = tpu.dynamic_rotate %35 by %c8_i32 dim 1 : vector<4x16xf32>, i32 -> vector<4x16xf32>
    %c8_i32_10 = arith.constant 8 : i32
    %37 = vector.broadcast %c8_i32_10 : i32 to vector<1x16xi32>
    %38 = arith.cmpi sge, %7, %37 : vector<1x16xi32>
    %cst_11 = arith.constant 0.000000e+00 : f32
    %39 = vector.shape_cast %38 : vector<1x16xi1> to vector<1x16xi1>
    %40 = vector.broadcast %39 : vector<1x16xi1> to vector<4x16xi1>
    %41 = vector.broadcast %cst_11 : f32 to vector<4x16xf32>
    %42 = arith.select %40, %36, %41 : vector<4x16xi1>, vector<4x16xf32>
    %43 = arith.addf %35, %42 : vector<4x16xf32>
    %c0_12 = arith.constant 0 : index
    %c0_13 = arith.constant 0 : index
    %44 = vector.load %arg6[%c0_12, %c0_13] : memref<4x1xf32, #tpu.memory_space<vmem>>, vector<4x1xf32>
    %45 = vector.broadcast %44 : vector<4x1xf32> to vector<4x16xf32>
    %46 = arith.addf %43, %45 : vector<4x16xf32>
    %47 = vector.extract_strided_slice %46 {offsets = [0, 15], sizes = [4, 1], strides = [1, 1]} : vector<4x16xf32> to vector<4x1xf32>
    %c0_14 = arith.constant 0 : index
    %c0_15 = arith.constant 0 : index
    %48 = vector.load %arg6[%c0_14, %c0_15] : memref<4x1xf32, #tpu.memory_space<vmem>>, vector<4x1xf32>
    tpu.vector_store %arg6[%c0_14, %c0_15], %47 {strides = array<i32>} : memref<4x1xf32, #tpu.memory_space<vmem>>, vector<4x1xf32>,
    %49 = vector.extract_strided_slice %46 {offsets = [0, 0], sizes = [2, 16], strides = [1, 1]} : vector<4x16xf32> to vector<2x16xf32>
    %50 = vector.extract_strided_slice %46 {offsets = [2, 0], sizes = [2, 16], strides = [1, 1]} : vector<4x16xf32> to vector<2x16xf32>
    %51 = arith.sitofp %10 : vector<1x16xi32> to vector<1x16xf32>
    %cst_16 = arith.constant 1.000000e+00 : f32
    %52 = vector.broadcast %cst_16 : f32 to vector<1x16xf32>
    %53 = arith.addf %51, %52 : vector<1x16xf32>
    %cst_17 = arith.constant 4.000000e+00 : f32
    %54 = vector.broadcast %cst_17 : f32 to vector<1x16xf32>
    %55 = arith.mulf %53, %54 : vector<1x16xf32>
    %cst_18 = arith.constant 1.000000e+00 : f32
    %56 = vector.broadcast %cst_18 : f32 to vector<1x16xf32>
    %57 = arith.divf %56, %55 : vector<1x16xf32>
    %58 = vector.broadcast %57 : vector<1x16xf32> to vector<2x16xf32>
    %59 = arith.mulf %49, %58 : vector<2x16xf32>
    %60 = vector.broadcast %57 : vector<1x16xf32> to vector<2x16xf32>
    %61 = arith.mulf %50, %60 : vector<2x16xf32>
    %62 = arith.mulf %59, %59 : vector<2x16xf32>
    %63 = arith.subf %61, %62 : vector<2x16xf32>
    %cst_19 = arith.constant 0.000000e+00 : f32
    %64 = vector.broadcast %cst_19 : f32 to vector<2x16xf32>
    %65 = arith.maximumf %63, %64 : vector<2x16xf32>
    %cst_20 = arith.constant 9.99999993E-9 : f32
    %66 = vector.broadcast %cst_20 : f32 to vector<2x16xf32>
    %67 = arith.addf %65, %66 : vector<2x16xf32>
    %68 = math.rsqrt %67 : vector<2x16xf32>
    %c0_21 = arith.constant 0 : index
    %c0_22 = arith.constant 0 : index
    %c0_23 = arith.constant 0 : index
    %69 = vector.load %arg3[%c0_21, %c0_22, %c0_23] : memref<1x4x1xf32, #tpu.memory_space<vmem>>, vector<1x4x1xf32>
    %c0_24 = arith.constant 0 : index
    %c0_25 = arith.constant 0 : index
    %c0_26 = arith.constant 0 : index
    %70 = vector.load %arg4[%c0_24, %c0_25, %c0_26] : memref<1x4x1xf32, #tpu.memory_space<vmem>>, vector<1x4x1xf32>
    %71 = vector.shape_cast %59 : vector<2x16xf32> to vector<2x1x16xf32>
    %72 = vector.broadcast %71 : vector<2x1x16xf32> to vector<2x4x16xf32>
    %73 = arith.subf %3, %72 : vector<2x4x16xf32>
    %74 = vector.shape_cast %68 : vector<2x16xf32> to vector<2x1x16xf32>
    %75 = vector.broadcast %74 : vector<2x1x16xf32> to vector<2x4x16xf32>
    %76 = arith.mulf %73, %75 : vector<2x4x16xf32>
    %77 = vector.broadcast %69 : vector<1x4x1xf32> to vector<2x4x16xf32>
    %78 = arith.mulf %76, %77 : vector<2x4x16xf32>
    %79 = vector.broadcast %70 : vector<1x4x1xf32> to vector<2x4x16xf32>
    %80 = arith.addf %78, %79 : vector<2x4x16xf32>
    %c0_27 = arith.constant 0 : index
    %c0_28 = arith.constant 0 : index
    %c0_29 = arith.constant 0 : index
    %81 = vector.load %arg5[%c0_27, %c0_28, %c0_29] : memref<2x4x16xf32, #tpu.memory_space<vmem>>, vector<2x4x16xf32>
    tpu.vector_store %arg5[%c0_27, %c0_28, %c0_29], %80 {strides = array<i32>} : memref<2x4x16xf32, #tpu.memory_space<vmem>>, vector<2x4x16xf32>,
    return
  }
  func.func @transform_0(%arg0: i32, %arg1: i32) -> (i32, i32, i32) {
    %c0_i32 = arith.constant 0 : i32
    %c0_i32_0 = arith.constant 0 : i32
    return %arg0, %c0_i32, %arg1 : i32, i32, i32
  }
  func.func @transform_1(%arg0: i32, %arg1: i32) -> (i32, i32, i32) {
    %c0_i32 = arith.constant 0 : i32
    %c0_i32_0 = arith.constant 0 : i32
    %c0_i32_1 = arith.constant 0 : i32
    %c0_i32_2 = arith.constant 0 : i32
    return %c0_i32, %c0_i32_0, %c0_i32_1 : i32, i32, i32
  }
  func.func @transform_2(%arg0: i32, %arg1: i32) -> (i32, i32, i32) {
    %c0_i32 = arith.constant 0 : i32
    %c0_i32_0 = arith.constant 0 : i32
    %c0_i32_1 = arith.constant 0 : i32
    %c0_i32_2 = arith.constant 0 : i32
    return %c0_i32, %c0_i32_0, %c0_i32_1 : i32, i32, i32
  }
  func.func @transform_3(%arg0: i32, %arg1: i32) -> (i32, i32, i32) {
    %c0_i32 = arith.constant 0 : i32
    %c0_i32_0 = arith.constant 0 : i32
    return %arg0, %c0_i32, %arg1 : i32, i32, i32
  }
}

</mosaic_0001>

<bundles_post_ra>
// kernel: tpu_custom_call.1
= control target key start
LH: loop header
LB: loop body
LE: loop exit
PB: predicated region body
PF: predicated region fallthrough
CT: control target
= control target key end

     0   :  { %vm23_vm0 = vcmask 125952   ;;  %s401_s0 = inlined_call_operand.vmem [shape: f32[2,4,16], index: 0, kind: input, shape index: {}]   ;;  %s402_s1 = inlined_call_operand.vmem [shape: f32[1,4,1], index: 1, kind: input, shape index: {}]   ;;  %s403_s2 = inlined_call_operand.vmem [shape: f32[1,4,1], index: 2, kind: input, shape index: {}]   ;;  %s404_s3 = inlined_call_operand.hbm [shape: f32[2,4,16], index: 3, kind: output, shape index: {}]  }
   0x1   :  { %v340_v0 = vld [vmem:[%s401_s0] sm:$0xf]  ;;  %v345_v1 = vld [vmem:[%s401_s0 + $0x4] sm:$0xf] }
   0x2   :  { %v24_v2 = vsel %vm23_vm0, %v340_v0, 0.0  ;;  %v31_v3 = vsel %vm23_vm0, %v345_v1, 0.0  ;;  %v38_v4 = vmul.f32 %v340_v0, %v340_v0  ;;  %v39_v5 = vmul.f32 %v345_v1, %v345_v1 }
   0x3   :  { %8 = vsyncpa [#allocation4], 0  ;;  %v25_v6 = vrot.slane %v24_v2, 4  ;;  %v32_v7 = vrot.slane %v31_v3, 4  ;;  %vm61_vm1 = vcmask 1041409   ;;  %vm66_vm2 = vcmask 1043459  }
   0x4   :  { %v40_v8 = vsel %vm23_vm0, %v38_v4, 0.0  ;;  %v47_v9 = vsel %vm23_vm0, %v39_v5, 0.0  ;;  %vm69_vm3 = vcmask 1041408   ;;  %s306_s0 = smov 16   ;;  %vm71_vm4 = vcmask 1047680   ;;  %s307_s16 = smov 113  }
   0x5   :  { %v26_v10 = vadd.f32 %v25_v6, %v24_v2  ;;  %v33_v11 = vadd.f32 %v32_v7, %v31_v3  ;;  %v41_v12 = vrot.slane %v40_v8, 4  ;;  %v48_v13 = vrot.slane %v47_v9, 4  ;;  %s308_s17 = smov 114   ;;  %s309_s18 = smov 116   ;;  %v159_v61 = vld [vmem:[%s402_s1] sm:$0xf] }
   0x6   :  { %v54_v39 = vlaneseq  ;;  %vm19_vm7 = vcmask 3072   ;;  %v310_v55 = vmov 0   ;;  %v311_v56 = vmov 0.0   ;;  %s312_s21 = smov 120   ;;  %v160_v4 = vld [vmem:[%s403_s2] sm:$0xf] }
   0x7   :  { %v27_v14 = vrot.slane %v26_v10, 2  ;;  %v34_v15 = vrot.slane %v33_v11, 2  ;;  %v42_v16 = vadd.f32 %v41_v12, %v40_v8  ;;  %v49_v17 = vadd.f32 %v48_v13, %v47_v9  ;;  %276 = vset.pattern.permute.xlu1 %v310_v55  ;;  %20 = vst.msk [vmem:[#allocation2] sm:$0xf] %vm19_vm7, %v311_v56  ;;  %277 = vset.pattern.permute.xlu0 %v310_v55  ;;  %s314_s1 = smov [#allocation3]  }
   0x8   :  { %v55_v40 = vand.u32 127, %v54_v39  ;;  %s254_s2 = sshll.u32 %s314_s1, 4  ;;  %s255_s2 = int_to_ptr.vmem [resolvable:$true] %s254_s2 }
   0x9   :  { %v28_v18 = vadd.f32 %v27_v14, %v26_v10  ;;  %v35_v19 = vadd.f32 %v34_v15, %v33_v11  ;;  %v43_v20 = vrot.slane %v42_v16, 2  ;;  %v50_v21 = vrot.slane %v49_v17, 2  ;;  %s282_s24 = scalar_lea.vmem %s255_s2, 128  ;;  %p287_p1 = scmp.lt.s32.totalorder %s255_s2, %s255_s2 }
   0xa   :  { %vm78_vm5 = vcmp.ge.s32.totalorder %v55_v40, 1  ;;  %vm93_vm6 = vcmp.ge.s32.totalorder %v55_v40, 2  ;;  %vm108_vm8 = vcmp.ge.s32.totalorder %v55_v40, 4  ;;  %v145_v5 = vcvt.s32.f32 %v55_v40  ;;  %p283_p0 = scmp.ne.s32.totalorder %s255_s2, %s282_s24  ;;  %p288_p2 = scmp.lt.s32.totalorder %s282_s24, %s282_s24 }
   0xb   :  { %v29_v22 = vrot.slane %v28_v18, 1  ;;  %v36_v23 = vrot.slane %v35_v19, 1  ;;  %v44_v24 = vadd.f32 %v43_v20, %v42_v16  ;;  %v51_v25 = vadd.f32 %v50_v21, %v49_v17 }
   0xc   :  { %v146_v6 = vadd.f32 1.0, %v145_v5  ;;  %vm123_vm9 = vcmp.ge.s32.totalorder %v55_v40, 8  ;;  %v313_v16 = vmov 1966171168   ;;  %v166_v21 = vshrl.u32 %v54_v39, 7  ;;  %p289_p3 = por %p288_p2, %p287_p1 }
   0xd   :  { %v30_v26 = vadd.f32 %v29_v22, %v28_v18  ;;  %v37_v27 = vadd.f32 %v36_v23, %v35_v19  ;;  %v45_v28 = vrot.slane %v44_v24, 1  ;;  %v52_v29 = vrot.slane %v51_v25, 1 }
   0xe   :  { %v132_v60 = vld [vmem:[#allocation2] sm:$0xf]  ;;  %v147_v7 = vmul.f32 4.0, %v146_v6  ;;  %v163_v17 = vunpack.c.l.s4 %v313_v16  ;;  %p290_p4 = pnand %p289_p3, %p283_p0 }
   0xf   :  { %v46_v30 = vadd.f32 %v45_v28, %v44_v24  ;;  %v53_v31 = vadd.f32 %v52_v29, %v51_v25  ;;  %v62_v32 = vsel %vm61_vm1, %v37_v27, %v30_v26  ;;  %v186_v28 = vsub.s32 0, %v166_v21 }
  0x10   :  { %278 = vrcp.f32 %v147_v7  ;;  %v164_v20 = vunpack.c.0.s8 %v163_v17 }
  0x11   :  { %v67_v33 = vsel %vm66_vm2, %v53_v31, %v46_v30 }
  0x12   :  { %v70_v34 = vsel %vm69_vm3, %v62_v32, %v67_v33  ;;  %v167_v24 = vsub.s32 %v164_v20, %v166_v21 }
  0x13   :  { %72 = vrot.lane.b32.xlu0 %v70_v34, %s306_s0 }
  0x1a   :  { %v279_v11 = vpop.eup %278 }
  0x85   :  { %v73_v35 = vpop.permute.xlu0 %72 }
  0x86   :  { %v74_v36 = vsel %vm71_vm4, %v73_v35, %v70_v34 }
  0x87   :  { %75 = vrot.lane.b32.xlu0 %v74_v36, %s306_s0 }
  0xf9   :  { %v76_v37 = vpop.permute.xlu0 %75 }
  0xfa   :  { %v77_v38 = vsel %vm71_vm4, %v76_v37, %v70_v34 }
  0xfb   :  { %82 = vrot.lane.b32.xlu1 %v77_v38, %s307_s16 }
 0x16d   :  { %v83_v41 = vpop.permute.xlu1 %82 }
 0x16e   :  { %v85_v42 = vsel %vm78_vm5, %v83_v41, 0.0 }
 0x16f   :  { %v86_v43 = vadd.f32 %v85_v42, %v70_v34 }
 0x171   :  { %87 = vrot.lane.b32.xlu1 %v86_v43, %s306_s0 }
 0x1e3   :  { %v88_v44 = vpop.permute.xlu1 %87 }
 0x1e4   :  { %v89_v45 = vsel %vm71_vm4, %v88_v44, %v86_v43 }
 0x1e5   :  { %90 = vrot.lane.b32.xlu0 %v89_v45, %s306_s0 }
 0x257   :  { %v91_v46 = vpop.permute.xlu0 %90 }
 0x258   :  { %v92_v47 = vsel %vm71_vm4, %v91_v46, %v86_v43 }
 0x259   :  { %97 = vrot.lane.b32.xlu1 %v92_v47, %s308_s17 }
 0x2cb   :  { %v98_v48 = vpop.permute.xlu1 %97 }
 0x2cc   :  { %v100_v49 = vsel %vm93_vm6, %v98_v48, 0.0 }
 0x2cd   :  { %v101_v50 = vadd.f32 %v100_v49, %v86_v43 }
 0x2cf   :  { %102 = vrot.lane.b32.xlu0 %v101_v50, %s306_s0 }
 0x341   :  { %v103_v51 = vpop.permute.xlu0 %102 }
 0x342   :  { %v104_v52 = vsel %vm71_vm4, %v103_v51, %v101_v50 }
 0x343   :  { %105 = vrot.lane.b32.xlu1 %v104_v52, %s306_s0 }
 0x3b5   :  { %v106_v53 = vpop.permute.xlu1 %105 }
 0x3b6   :  { %v107_v54 = vsel %vm71_vm4, %v106_v53, %v101_v50 }
 0x3b7   :  { %112 = vrot.lane.b32.xlu0 %v107_v54, %s309_s18 }
 0x429   :  { %v113_v57 = vpop.permute.xlu0 %112 }
 0x42a   :  { %v115_v58 = vsel %vm108_vm8, %v113_v57, 0.0 }
 0x42b   :  { %v116_v59 = vadd.f32 %v115_v58, %v101_v50 }
 0x42d   :  { %117 = vrot.lane.b32.xlu1 %v116_v59, %s306_s0 }
 0x431   :  { %135 = vperm.xlu1 %276, %v132_v60  }
 0x435   :  { %235 = vperm.xlu1 %276, %v159_v61  }
 0x49f   :  { %v118_v62 = vpop.permute.xlu1 %117 }
 0x4a0   :  { %v119_v63 = vsel %vm71_vm4, %v118_v62, %v116_v59 }
 0x4a1   :  { %120 = vrot.lane.b32.xlu0 %v119_v63, %s306_s0 }
 0x4b0   :  { %v136_v12 = vpop.permute.xlu1 %135 }
 0x4b4   :  { %v236_v44 = vpop.permute.xlu1 %235 }
 0x513   :  { %v121_v2 = vpop.permute.xlu0 %120 }
 0x514   :  { %v122_v3 = vsel %vm71_vm4, %v121_v2, %v116_v59 }
 0x515   :  { %127 = vrot.lane.b32.xlu0 %v122_v3, %s312_s21 }
 0x519   :  { %242 = vperm.xlu0 %277, %v160_v4  }
 0x587   :  { %v128_v8 = vpop.permute.xlu0 %127 }
 0x588   :  { %v130_v9 = vsel %vm123_vm9, %v128_v8, 0.0 }
 0x589   :  { %v131_v10 = vadd.f32 %v130_v9, %v116_v59 }
 0x58b   :  { %v138_v13 = vadd.f32 %v136_v12, %v131_v10 }
 0x58d   :  { %v150_v14 = vmul.f32 %v279_v11, %v138_v13  ;;  %140 = vrot.lane.b32.xlu1 %v138_v13, %s307_s16 }
 0x58f   :  { %v151_v15 = vmul.f32 %v150_v14, %v150_v14  ;;  %v168_v25 = vrot.slane %v150_v14, %v167_v24 }
 0x591   :  { %v153_v18 = vrot.slane %v151_v15, 6  ;;  %v169_v26 = vcombine.high %v168_v25, %v168_v25  ;;  %v176_v27 = vrot.slane %v168_v25, %v167_v24 }
 0x593   :  { %v155_v19 = vsub.f32 %v150_v14, %v153_v18  ;;  %v183_v30 = vrot.slane %v169_v26, %v167_v24  ;;  %v187_v32 = vrot.slane %v176_v27, %v186_v28 }
 0x595   :  { %v156_v22 = vmax.f32 %v155_v19, 0.0  ;;  %v191_v35 = vrot.slane %v183_v30, %v186_v28  ;;  %v194_v38 = vsub.f32 %v340_v0, %v187_v32 }
 0x597   :  { %v157_v23 = vadd.f32 1e-08, %v156_v22  ;;  %v195_v41 = vsub.f32 %v345_v1, %v191_v35 }
 0x598   :  { %v243_v45 = vpop.permute.xlu0 %242 }
 0x599   :  { %280 = vrsqrt.f32 %v157_v23 }
 0x5a3   :  { %v281_v29 = vpop.eup %280 }
 0x5a4   :  { %v203_v31 = vrot.slane %v281_v29, %v167_v24 }
 0x5a6   :  { %v204_v33 = vcombine.high %v203_v31, %v203_v31  ;;  %v211_v34 = vrot.slane %v203_v31, %v167_v24 }
 0x5a8   :  { %v218_v36 = vrot.slane %v204_v33, %v167_v24  ;;  %v219_v37 = vcombine.high %v211_v34, %v211_v34 }
 0x5aa   :  { %v220_v39 = vcombine.high %v218_v36, %v218_v36  ;;  %v224_v40 = vrot.slane %v219_v37, %v186_v28 }
 0x5ac   :  { %v228_v42 = vrot.slane %v220_v39, %v186_v28  ;;  %v231_v43 = vmul.f32 %v224_v40, %v194_v38 }
 0x5ae   :  { %v232_v46 = vmul.f32 %v228_v42, %v195_v41  ;;  %v238_v47 = vmul.f32 %v236_v44, %v231_v43 }
 0x5b0   :  { %v239_v48 = vmul.f32 %v236_v44, %v232_v46  ;;  %v245_v49 = vadd.f32 %v243_v45, %v238_v47 }
 0x5b2   :  { %v246_v50 = vadd.f32 %v243_v45, %v239_v48  ;;  %247 = vst.msk [vmem:[#allocation3] sm:$0xf] %vm23_vm0, %v245_v49 }
 0x5b4   :  { %248 = vst.msk [vmem:[#allocation3 + $0x4] sm:$0xf] %vm23_vm0, %v246_v50 }
 0x5b5   :  { %293 = shalt.err (!%p290_p4)
}
 0x5b6   :  { %s294_s27 = scalar_lea.hbm %s404_s3, 128 }
 0x5b7   :  { %p295_p5 = scmp.ne.s32.totalorder %s404_s3, %s294_s27  ;;  %p298_p6 = scmp.lt.u32.totalorder %s294_s27, %s404_s3 }
 0x5b9   :  { %p300_p7 = pnand %p298_p6, %p295_p5 }
 0x5bb   :  { %303 = shalt.err (!%p300_p7)
}
 0x5bc   :  { %s315_s5 = smov 64   ;;  %s316_s6 = smov 4  }
 0x5bd   :  { %260 = dma.vmem_to_hbm [thread:$0]  %s255_s2, 128, %s404_s3, [#allocation4], %s315_s5, %s315_s5, %s316_s6  }
 0x5ff   :  { %v141_v0 = vpop.permute.xlu1 %140 }
 0x600   :  { %144 = vst.msk [vmem:[#allocation2] sm:$0xf] %vm19_vm7, %v141_v0 }
 0x601   :  { %304 = dma.done.wait [#allocation4], 128  }
 0x602   :  { %305 = vsyncadd [#allocation4], 4294967168 }
 0x603   :  { %264 = vsyncpa [#allocation4], 1 }

</bundles_post_ra>
